<compile_context>
chip_gen: v7x
topology: tpu7x:2x2x1
jax: 0.10.0
libtpu: 0.0.40
codegen_flags: <defaults>
</compile_context>

<pallas_src>
import jax
import jax.numpy as jnp
from jax.experimental import pallas as pl
from jax.experimental.pallas import tpu as pltpu


def _dma_copy_kernel(x_hbm, o_hbm, sem):
    """Single whole-array HBM -> HBM DMA (no VMEM staging, no grid loop)."""
    cp = pltpu.make_async_copy(x_hbm, o_hbm, sem)
    cp.start()
    cp.wait()


def squeeze_forward(x):
    """Pallas equivalent of torch.Tensor.squeeze(): drop all size-1 dims."""
    squeezed_shape = tuple(d for d in x.shape if d != 1)

    # Degenerate cases (empty tensor, or everything squeezed to a scalar):
    # nothing meaningful to DMA — squeeze is purely metadata.
    if x.size == 0 or len(squeezed_shape) == 0:
        return jnp.reshape(x, squeezed_shape)

    # Row-major reshape of a contiguous array: metadata-only view in XLA.
    x_sq = jnp.reshape(x, squeezed_shape)

    return pl.pallas_call(
        _dma_copy_kernel,
        out_shape=jax.ShapeDtypeStruct(squeezed_shape, x.dtype),
        in_specs=[pl.BlockSpec(memory_space=pl.ANY)],
        out_specs=pl.BlockSpec(memory_space=pl.ANY),
        scratch_shapes=[pltpu.SemaphoreType.DMA(())],
        compiler_params=pltpu.CompilerParams(has_side_effects=True),
    )(x_sq)


def reference_forward(x):
    """Pure-JAX reference: same semantics as torch's x.squeeze()."""
    return jnp.squeeze(x)


if __name__ == "__main__":
    key = jax.random.PRNGKey(0)

    # Shape with interspersed size-1 dims: (2, 1, 4, 16, 1, 16) -> (2, 4, 16, 16)
    x = jax.random.normal(key, (2, 1, 4, 16, 1, 16), jnp.float32)

    out = jax.block_until_ready(squeeze_forward(x))
    ref = jax.block_until_ready(reference_forward(x))
    assert out.shape == (2, 4, 16, 16), out.shape
    assert out.shape == ref.shape, (out.shape, ref.shape)
    assert jnp.array_equal(out, ref), float(jnp.max(jnp.abs(out - ref)))

    # Second check: different dtype / size-1 placement: (1, 8, 1, 32) -> (8, 32)
    x2 = jax.random.normal(jax.random.PRNGKey(1), (1, 8, 1, 32), jnp.bfloat16)
    out2 = jax.block_until_ready(squeeze_forward(x2))
    ref2 = jax.block_until_ready(reference_forward(x2))
    assert out2.shape == (8, 32), out2.shape
    assert jnp.array_equal(out2, ref2)

    # Third check: no size-1 dims at all (squeeze is the identity).
    x3 = jax.random.normal(jax.random.PRNGKey(2), (4, 8, 128), jnp.float32)
    out3 = jax.block_until_ready(squeeze_forward(x3))
    ref3 = jax.block_until_ready(reference_forward(x3))
    assert out3.shape == (4, 8, 128), out3.shape
    assert jnp.array_equal(out3, ref3)

    print("KERNEL_OK")
</pallas_src>

<mosaic_0001>
module attributes {stable_mosaic.version = 11 : i64} {
  func.func @_dma_copy_kernel(%arg0: memref<2x4x16x16xf32, #tpu.memory_space<any>>, %arg1: memref<2x4x16x16xf32, #tpu.memory_space<any>>, %arg2: memref<!tpu.dma_semaphore, #tpu.memory_space<semaphore_mem>>) attributes {dimension_semantics = [], scalar_prefetch = 0 : i64, scratch_operands = 1 : i64, tpu.core_type = #tpu.core_type<tc>} {
    tpu.enqueue_dma source(%arg0 : memref<2x4x16x16xf32, #tpu.memory_space<any>>) target(%arg1 : memref<2x4x16x16xf32, #tpu.memory_space<any>>) target_semaphore(%arg2 : memref<!tpu.dma_semaphore, #tpu.memory_space<semaphore_mem>>)
    tpu.wait_dma2 semaphore(%arg2 : memref<!tpu.dma_semaphore, #tpu.memory_space<semaphore_mem>>) src(%arg0 : memref<2x4x16x16xf32, #tpu.memory_space<any>>) dst(%arg1 : memref<2x4x16x16xf32, #tpu.memory_space<any>>)
    return
  }
}

</mosaic_0001>

<bundles_post_ra>
// kernel: tpu_custom_call.1
= control target key start
LH: loop header
LB: loop body
LE: loop exit
PB: predicated region body
PF: predicated region fallthrough
CT: control target
= control target key end

     0   :  { %s36_s6 = smov [#allocation2]   ;;  %s37_s7 = smov [#allocation3]   ;;  %s55_s0 = inlined_call_operand.hbm [shape: f32[2,4,16,16], index: 0, kind: input, shape index: {}]   ;;  %s56_s1 = inlined_call_operand.hbm [shape: f32[2,4,16,16], index: 1, kind: output, shape index: {}]  }
   0x1   :  { %s38_s8 = smov 0  }
   0x2   :  { %18 = dma.general %s55_s0, 2048, %s56_s1, %s36_s6, %s37_s7, [#allocation4], %s38_s8, 0  }
   0x3   :  { %34 = dma.done.wait [#allocation2], 2048 }
   0x4   :  { %35 = vsyncadd [#allocation2], 4294965248 }
   0x5   :  { %24 = vsyncmov [#allocation2] }
   0x8   :  { %s25_s13 = vpop.sfrf %24 }
   0x9   :  { %p30_p0 = scmp.ne.s32.totalorder %s25_s13, 0 }
   0xb   :  { %29 = shalt.err (%p30_p0)  }

</bundles_post_ra>
